<compile_context>
chip_gen: v5e
topology: v5e:2x2
jax: 0.10.0
libtpu: 0.0.40
codegen_flags: <defaults>
</compile_context>

<pallas_src>
import functools
import math

import jax
import jax.numpy as jnp
from jax import lax
from jax.experimental import pallas as pl
from jax.experimental.pallas import tpu as pltpu


def _attn_kernel(q_ref, k_ref, v_ref, mask_ref, o_ref, *, compute_dtype):
    # q/k/v_ref: (HB, S, D) in the caller's dtype (f32)   mask_ref: (S, S)   o_ref: (HB, S, D)
    # Cast to the MXU compute dtype *inside* the kernel: the DMA already paid the HBM bytes,
    # so this VPU cast is free (no extra HBM pass like a wrapper-side astype would add).
    q = q_ref[...].astype(compute_dtype)
    k = k_ref[...].astype(compute_dtype)
    v = v_ref[...].astype(compute_dtype)
    mask = mask_ref[...].astype(jnp.float32)  # no-op when the mask is already f32

    d = q_ref.shape[-1]
    scale = 1.0 / math.sqrt(d)

    # qk[h, i, j] = sum_d q[h,i,d] * k[h,j,d] -- contract D directly (no k transpose /
    # XLU work), bf16 operands with f32 accumulation on the MXU.
    qk = lax.dot_general(
        q, k,
        dimension_numbers=(((2,), (2,)), ((0,), (0,))),
        preferred_element_type=jnp.float32,
    )  # (HB, S, S) f32

    # Scale + mask on the small (S, S) score tile (S=32 << D): minimum-VPU-work placement.
    qk = qk * scale + mask[None, :, :]

    # Numerically stable softmax in f32; the approx reciprocal runs on the EUP slot.
    m = jnp.max(qk, axis=-1, keepdims=True)
    p = jnp.exp(qk - m)
    l = jnp.sum(p, axis=-1, keepdims=True)
    p = p * pl.reciprocal(l, approx=True)

    # dropout(p=0.0) is an identity -> no-op.

    out = lax.dot_general(
        p.astype(compute_dtype), v,
        dimension_numbers=(((2,), (1,)), ((0,), (0,))),
        preferred_element_type=jnp.float32,
    )  # (HB, S, D) f32
    o_ref[...] = out.astype(o_ref.dtype)


def attention(query, key, value, attn_mask, *, head_block=None,
              compute_dtype=jnp.bfloat16, out_dtype=None):
    """Pallas TPU forward pass of the reference module.

    query/key/value: (B, H, S, D), attn_mask: (1, 1, S, S).
    Output dtype == query.dtype unless `out_dtype` is given (bf16 saves writeback bytes).
    """
    B, H, S, D = query.shape
    assert key.shape == (B, H, S, D) and value.shape == (B, H, S, D)
    # The mask BlockSpec below uses a constant block index (fetched once); that is only
    # correct for a grid-invariant (1, 1, S, S) mask, exactly what the module uses.
    assert attn_mask.shape == (1, 1, S, S), (
        f"attn_mask must be (1,1,{S},{S}), got {attn_mask.shape}")

    if out_dtype is None:
        out_dtype = query.dtype

    in_item = jnp.dtype(query.dtype).itemsize
    out_item = jnp.dtype(out_dtype).itemsize
    mask_item = jnp.dtype(attn_mask.dtype).itemsize
    bytes_per_head = S * D * (3 * in_item + out_item)

    if head_block is None:
        # Per-step working set budget (x2 with double buffering). 16 MiB is comfortably on
        # the HBM-roofline plateau and, doubled + slack, still fits v7x's 64 MiB VMEM.
        budget = 16 * 1024 * 1024
        head_block = max(1, min(H, budget // max(bytes_per_head, 1)))
        # Keep enough grid steps that each TensorCore (v7x has 2) runs several iterations,
        # so the double-buffered pipeline reaches steady state; extra steps are nearly free.
        min_steps = min(8, B * H)
        while head_block > 1 and (H % head_block or B * (H // head_block) < min_steps):
            head_block -= 1
    assert H % head_block == 0
    HB = head_block

    # VMEM request computed from the real double-buffered working set (+4 MiB compiler
    # slack), capped at 48 MiB so we never ask for all of v7x's 64 MiB physical VMEM.
    step_bytes = HB * S * D * (3 * in_item + out_item)
    vmem_needed = 2 * step_bytes + 2 * S * S * mask_item + (4 << 20)
    vmem_limit = int(min(48 << 20, max(vmem_needed, 16 << 20)))

    # Advisory cost hint so XLA overlaps surrounding ops with this memory-bound call.
    cost = pl.CostEstimate(
        flops=4 * B * H * S * S * D,
        transcendentals=B * H * S * S,
        bytes_accessed=(3 * B * H * S * D * in_item
                        + B * H * S * D * out_item
                        + S * S * mask_item),
    )

    qkv_spec = pl.BlockSpec((None, HB, S, D), lambda b, h: (b, h, 0, 0))
    # Grid-invariant block index -> the 4 KiB mask is DMA'd once, not re-fetched per step.
    mask_spec = pl.BlockSpec((None, None, S, S), lambda b, h: (0, 0, 0, 0))
    out_spec = pl.BlockSpec((None, HB, S, D), lambda b, h: (b, h, 0, 0))

    kernel = functools.partial(_attn_kernel, compute_dtype=compute_dtype)

    return pl.pallas_call(
        kernel,
        out_shape=jax.ShapeDtypeStruct((B, H, S, D), out_dtype),
        grid_spec=pltpu.PrefetchScalarGridSpec(
            num_scalar_prefetch=0,
            grid=(B, H // HB),
            in_specs=[qkv_spec, qkv_spec, qkv_spec, mask_spec],
            out_specs=out_spec,
        ),
        compiler_params=pltpu.CompilerParams(
            dimension_semantics=("parallel", "parallel"),
            vmem_limit_bytes=vmem_limit,
        ),
        cost_estimate=cost,
    )(query, key, value, attn_mask)


def attention_ref(query, key, value, attn_mask):
    d = query.shape[-1]
    qk = jnp.einsum("bhsd,bhtd->bhst", query, key) / math.sqrt(d)
    qk = qk + attn_mask
    w = jax.nn.softmax(qk, axis=-1)
    return jnp.einsum("bhst,bhtd->bhsd", w, value)


if __name__ == "__main__":
    # Small shapes consistent with the module's forward semantics:
    # (B, H, S, D) with S=32 matching the (1, 1, 32, 32) mask, D a multiple of 128.
    B, H, S, D = 1, 8, 32, 512

    key0 = jax.random.PRNGKey(0)
    kq, kk, kv, km = jax.random.split(key0, 4)
    query = jax.random.normal(kq, (B, H, S, D), dtype=jnp.float32)
    key_ = jax.random.normal(kk, (B, H, S, D), dtype=jnp.float32)
    value = jax.random.normal(kv, (B, H, S, D), dtype=jnp.float32)
    attn_mask = jax.random.normal(km, (1, 1, S, S), dtype=jnp.float32)

    out = attention(query, key_, value, attn_mask)
    out = jax.block_until_ready(out)

    ref = attention_ref(query, key_, value, attn_mask)
    assert out.shape == (B, H, S, D)
    assert out.dtype == query.dtype
    # bf16 MXU operands + approx reciprocal -> looser tolerance than pure f32.
    max_err = float(jnp.max(jnp.abs(out - ref)))
    assert jnp.allclose(out, ref, atol=5e-2, rtol=5e-2), (
        f"mismatch vs reference (max abs err {max_err})")

    print("KERNEL_OK")
</pallas_src>

<mosaic_0001>
module attributes {stable_mosaic.version = 11 : i64} {
  func.func @_attn_kernel(%arg0: i32, %arg1: i32, %arg2: memref<1x1x32x512xf32, #tpu.memory_space<vmem>>, %arg3: memref<1x1x32x512xf32, #tpu.memory_space<vmem>>, %arg4: memref<1x1x32x512xf32, #tpu.memory_space<vmem>>, %arg5: memref<1x1x32x32xf32, #tpu.memory_space<vmem>>, %arg6: memref<1x1x32x512xf32, #tpu.memory_space<vmem>>) attributes {dimension_semantics = [#tpu.dimension_semantics<parallel>, #tpu.dimension_semantics<parallel>], iteration_bounds = array<i64: 1, 8>, scalar_prefetch = 0 : i64, scratch_operands = 0 : i64, tpu.core_type = #tpu.core_type<tc>, window_params = [{transform_indices = @transform_0, window_bounds = array<i64: 1, 1, 32, 512>}, {transform_indices = @transform_1, window_bounds = array<i64: 1, 1, 32, 512>}, {transform_indices = @transform_2, window_bounds = array<i64: 1, 1, 32, 512>}, {pipeline_mode = #tpu.pipeline_mode<synchronous>, transform_indices = @transform_3, window_bounds = array<i64: 1, 1, 32, 32>}, {transform_indices = @transform_4, window_bounds = array<i64: 1, 1, 32, 512>}]} {
    %c0 = arith.constant 0 : index
    %c0_0 = arith.constant 0 : index
    %c0_1 = arith.constant 0 : index
    %c0_2 = arith.constant 0 : index
    %0 = vector.load %arg2[%c0, %c0_0, %c0_1, %c0_2] : memref<1x1x32x512xf32, #tpu.memory_space<vmem>>, vector<1x1x32x512xf32>
    %1 = vector.shape_cast %0 : vector<1x1x32x512xf32> to vector<1x32x512xf32>
    %2 = arith.truncf %1 : vector<1x32x512xf32> to vector<1x32x512xbf16>
    %c0_3 = arith.constant 0 : index
    %c0_4 = arith.constant 0 : index
    %c0_5 = arith.constant 0 : index
    %c0_6 = arith.constant 0 : index
    %3 = vector.load %arg3[%c0_3, %c0_4, %c0_5, %c0_6] : memref<1x1x32x512xf32, #tpu.memory_space<vmem>>, vector<1x1x32x512xf32>
    %4 = vector.shape_cast %3 : vector<1x1x32x512xf32> to vector<1x32x512xf32>
    %5 = arith.truncf %4 : vector<1x32x512xf32> to vector<1x32x512xbf16>
    %c0_7 = arith.constant 0 : index
    %c0_8 = arith.constant 0 : index
    %c0_9 = arith.constant 0 : index
    %c0_10 = arith.constant 0 : index
    %6 = vector.load %arg4[%c0_7, %c0_8, %c0_9, %c0_10] : memref<1x1x32x512xf32, #tpu.memory_space<vmem>>, vector<1x1x32x512xf32>
    %7 = vector.shape_cast %6 : vector<1x1x32x512xf32> to vector<1x32x512xf32>
    %8 = arith.truncf %7 : vector<1x32x512xf32> to vector<1x32x512xbf16>
    %c0_11 = arith.constant 0 : index
    %c0_12 = arith.constant 0 : index
    %c0_13 = arith.constant 0 : index
    %c0_14 = arith.constant 0 : index
    %9 = vector.load %arg5[%c0_11, %c0_12, %c0_13, %c0_14] : memref<1x1x32x32xf32, #tpu.memory_space<vmem>>, vector<1x1x32x32xf32>
    %10 = vector.shape_cast %9 : vector<1x1x32x32xf32> to vector<32x32xf32>
    %cst = arith.constant dense<0.000000e+00> : vector<1x32x32xf32>
    %11 = tpu.matmul %2, %5, %cst {dimension_numbers = #tpu.dot_dimension_numbers<[2], [2], [1], [1], [0, 0, 0, 1, 1, 1], [0], [0]>} : vector<1x32x512xbf16>, vector<1x32x512xbf16>, vector<1x32x32xf32> -> vector<1x32x32xf32>
    %cst_15 = arith.constant 0.0441941731 : f32
    %12 = vector.broadcast %cst_15 : f32 to vector<1x32x32xf32>
    %13 = arith.mulf %11, %12 : vector<1x32x32xf32>
    %14 = vector.shape_cast %10 : vector<32x32xf32> to vector<1x32x32xf32>
    %15 = arith.addf %13, %14 : vector<1x32x32xf32>
    %cst_16 = arith.constant dense<0xFF800000> : vector<1x32xf32>
    %16 = vector.multi_reduction <maximumf>, %15, %cst_16 [2] : vector<1x32x32xf32> to vector<1x32xf32>
    %17 = vector.shape_cast %16 : vector<1x32xf32> to vector<1x32x1xf32>
    %18 = vector.broadcast %17 : vector<1x32x1xf32> to vector<1x32x32xf32>
    %19 = arith.subf %15, %18 : vector<1x32x32xf32>
    %20 = math.exp %19 : vector<1x32x32xf32>
    %cst_17 = arith.constant dense<0.000000e+00> : vector<1x32xf32>
    %21 = vector.multi_reduction <add>, %20, %cst_17 [2] : vector<1x32x32xf32> to vector<1x32xf32>
    %22 = vector.shape_cast %21 : vector<1x32xf32> to vector<1x32x1xf32>
    %23 = tpu.reciprocal %22 {approx = true} : vector<1x32x1xf32> -> vector<1x32x1xf32>
    %24 = vector.broadcast %23 : vector<1x32x1xf32> to vector<1x32x32xf32>
    %25 = arith.mulf %20, %24 : vector<1x32x32xf32>
    %26 = arith.truncf %25 : vector<1x32x32xf32> to vector<1x32x32xbf16>
    %cst_18 = arith.constant dense<0.000000e+00> : vector<1x32x512xf32>
    %27 = tpu.matmul %26, %8, %cst_18 {dimension_numbers = #tpu.dot_dimension_numbers<[2], [1], [1], [2], [0, 0, 0, 1, 1, 2], [0], [0]>} : vector<1x32x32xbf16>, vector<1x32x512xbf16>, vector<1x32x512xf32> -> vector<1x32x512xf32>
    %c0_19 = arith.constant 0 : index
    %c0_20 = arith.constant 0 : index
    %c0_21 = arith.constant 0 : index
    %c0_22 = arith.constant 0 : index
    %28 = vector.load %arg6[%c0_19, %c0_20, %c0_21, %c0_22] : memref<1x1x32x512xf32, #tpu.memory_space<vmem>>, vector<1x1x32x512xf32>
    %29 = vector.shape_cast %28 : vector<1x1x32x512xf32> to vector<1x32x512xf32>
    %30 = vector.shape_cast %27 : vector<1x32x512xf32> to vector<1x1x32x512xf32>
    tpu.vector_store %arg6[%c0_19, %c0_20, %c0_21, %c0_22], %30 {strides = array<i32>} : memref<1x1x32x512xf32, #tpu.memory_space<vmem>>, vector<1x1x32x512xf32>,
    return
  }
  func.func @transform_0(%arg0: i32, %arg1: i32) -> (i32, i32, i32, i32) {
    %c0_i32 = arith.constant 0 : i32
    %c0_i32_0 = arith.constant 0 : i32
    %c0_i32_1 = arith.constant 0 : i32
    return %arg0, %arg1, %c0_i32, %c0_i32_0 : i32, i32, i32, i32
  }
  func.func @transform_1(%arg0: i32, %arg1: i32) -> (i32, i32, i32, i32) {
    %c0_i32 = arith.constant 0 : i32
    %c0_i32_0 = arith.constant 0 : i32
    %c0_i32_1 = arith.constant 0 : i32
    return %arg0, %arg1, %c0_i32, %c0_i32_0 : i32, i32, i32, i32
  }
  func.func @transform_2(%arg0: i32, %arg1: i32) -> (i32, i32, i32, i32) {
    %c0_i32 = arith.constant 0 : i32
    %c0_i32_0 = arith.constant 0 : i32
    %c0_i32_1 = arith.constant 0 : i32
    return %arg0, %arg1, %c0_i32, %c0_i32_0 : i32, i32, i32, i32
  }
  func.func @transform_3(%arg0: i32, %arg1: i32) -> (i32, i32, i32, i32) {
    %c0_i32 = arith.constant 0 : i32
    %c0_i32_0 = arith.constant 0 : i32
    %c0_i32_1 = arith.constant 0 : i32
    %c0_i32_2 = arith.constant 0 : i32
    %c0_i32_3 = arith.constant 0 : i32
    return %c0_i32, %c0_i32_0, %c0_i32_1, %c0_i32_2 : i32, i32, i32, i32
  }
  func.func @transform_4(%arg0: i32, %arg1: i32) -> (i32, i32, i32, i32) {
    %c0_i32 = arith.constant 0 : i32
    %c0_i32_0 = arith.constant 0 : i32
    %c0_i32_1 = arith.constant 0 : i32
    return %arg0, %arg1, %c0_i32, %c0_i32_0 : i32, i32, i32, i32
  }
}

</mosaic_0001>

<bundles_post_ra>
// kernel: tpu_custom_call.1
= control target key start
LH: loop header
LB: loop body
LE: loop exit
PB: predicated region body
PF: predicated region fallthrough
CT: control target
= control target key end

     0   :  { %s1619_s0 = inlined_call_operand.hbm [shape: f32[1,8,32,512], index: 0, kind: input, shape index: {}]   ;;  %s1620_s1 = inlined_call_operand.hbm [shape: f32[1,8,32,512], index: 1, kind: input, shape index: {}]   ;;  %s1621_s2 = inlined_call_operand.hbm [shape: f32[1,8,32,512], index: 2, kind: input, shape index: {}]   ;;  %s1622_s3 = inlined_call_operand.hbm [shape: f32[1,1,32,32], index: 3, kind: input, shape index: {}]   ;;  %s1623_s4 = inlined_call_operand.hbm [shape: f32[1,8,32,512], index: 4, kind: output, shape index: {}]  }
   0x1   :  { %1633 = sst [smem:[#allocation20_spill]] %s1619_s0 }
   0x2   :  { %1634 = sst [smem:[#allocation21_spill]] %s1620_s1 }
   0x3   :  { %1635 = sst [smem:[#allocation22_spill]] %s1622_s3 }
   0x4   :  { %9 = vsyncpa [#allocation3], 0 }
   0x5   :  { %11 = vsyncpa [#allocation3 + $0x1], 0 }
   0x6   :  { %12 = vsyncpa [#allocation6], 0 }
   0x7   :  { %14 = vsyncpa [#allocation6 + $0x1], 0 }
   0x8   :  { %15 = vsyncpa [#allocation9], 0 }
   0x9   :  { %16 = vsyncpa [#allocation4], 0 }
   0xa   :  { %18 = vsyncpa [#allocation4 + $0x1], 0  ;;  %s1330_s15 = smov 0   ;;  %s1332_s16 = smov 0  }
   0xb   :  { %s1334_s17 = smov 0   ;;  %s1336_s18 = smov 0  }
   0xc   :  { %s1338_s19 = smov 0   ;;  %s1340_s20 = smov 0  }
   0xd LB: > { %1636 = sst [smem:[#allocation15_spill]] %s1276_s15  ;;  %s33_s21 = sadd.s32 1, %s1292_s19  ;;  %s1296_s20 = sphi %s1340_s20, %s24_s20   ;;  %s1292_s19 = sphi %s1338_s19, %s1656_s19   ;;  %s1288_s18 = sphi %s1336_s18, %s1655_s18   ;;  %s1284_s17 = sphi %s1334_s17, %s1659_s17   ;;  %s1280_s16 = sphi %s1332_s16, %s1658_s16   ;;  %s1276_s15 = sphi %s1330_s15, %s1657_s15  }
   0xe   : > { %1637 = sst [smem:[#allocation16_spill]] %s1292_s19  ;;  %s45_s22 = sadd.s32 1, %s1284_s17 }
   0xf   : > { %p34_p0 = scmp.ge.s32.totalorder %s33_s21, 8  ;;  %p52_p1 = scmp.ne.s32.totalorder %s1284_s17, %s1280_s16 }
  0x10   : > { %p53_p2 = scmp.eq.s32.totalorder %s1296_s20, 0  ;;  %p1012_p4 = scmp.lt.s32.totalorder %s1296_s20, 8 }
  0x11   : > { %s1661_s21 = smov (%p34_p0, %s33_s21), 0  ;;  %s1628_s24 = sand.u32 1, %s1284_s17  }
  0x12   : > { %1638 = sst [smem:[#allocation17_spill]] %s1661_s21  ;;  %p54_p3 = por %p53_p2, %p52_p1 }
  0x13   : > { %s41_s23 = ssub.s32 %s1292_s19, %s1661_s21  ;;  %s1376_s25 = sshll.u32 %s1628_s24, 7 }
  0x14   : > { %p43_p5 = scmp.eq.s32.totalorder %s41_s23, 0  ;;  %s1379_s26 = sshll.u32 %s1292_s19, 7 }
  0x15   : > { %p1381_p6 = pnand %p1012_p4, %p54_p3  ;;  %s225_s29 = sand.u32 1, %s1296_s20  }
  0x16   : > { %s1386_s28 = scalar_select %p43_p5, %s1284_s17, %s45_s22  }
  0x17   : > { %s1641_s1 = sld [smem:[#allocation21_spill]]  ;;  %s229_s7 = scalar_lea.vmem [#allocation5], %s1376_s25 }
  0x18   : > { %1640 = sst [smem:[#allocation18_spill]] %s1386_s28  ;;  %s239_s8 = sshll.u32 %s229_s7, 4  ;;  %s240_s8 = int_to_ptr.vmem [resolvable:$true] %s239_s8 }
  0x19   : > { %s1394_s10 = scalar_lea.sflag [#allocation6], %s225_s29  ;;  %s1624_s11 = smov 512  }
  0x1a   : > { %s1626_s12 = smov 32   ;;  %s1403_s13 = sadd.s32 4294967295, %s1296_s20  }
  0x1b   : > { %s945_s14 = sadd.s32 4294967294, %s1296_s20   ;;  %p58_p7 = scmp.ne.s32.totalorder %s1280_s16, %s1276_s15 }
  0x1c   : > { %p59_p8 = scmp.eq.s32.totalorder %s1403_s13, 0  ;;  %p161_p9 = scmp.eq.s32.totalorder %s1403_s13, 7 }
  0x1d   : > { %s236_s6 = scalar_lea.hbm %s1641_s1, %s1379_s26  ;;  %p167_p10 = scmp.eq.s32.totalorder %s945_s14, 7 }
  0x1e   : > { %s237_s9 = sshll.u32 %s236_s6, 4  ;;  %p946_p11 = scmp.ge.s32.totalorder %s1296_s20, 1  ;;  %s238_s9 = int_to_ptr.hbm [resolvable:$true] %s237_s9 }
  0x1f   : > { %1003 = dma.hbm_to_vmem [thread:$0]  (!%p1381_p6), %s238_s9, 2048, %s240_s8, %s1394_s10, %s1624_s11, %s1624_s11, %s1626_s12  }
  0x20   : > { %p1413_p12 = por %p59_p8, %p58_p7  ;;  %p1420_p13 = por %p161_p9, %p52_p1 }
  0x21   : > { %p1424_p0 = por %p167_p10, %p58_p7  ;;  %p174_p2 = scmp.lt.s32.totalorder %s1296_s20, 9 }
  0x22   : > { %s1646_s3 = sld [smem:[#allocation22_spill]]  ;;  %s1300_s8 = smov [#allocation8]  }
  0x23   : > { %s1644_s29 = scalar_select %p1424_p0, 1, 0 }
  0x24   : > { %p1432_p3 = pnand %p946_p11, %p174_p2  ;;  %s187_s9 = sshll.u32 %s1300_s8, 4  ;;  %s188_s9 = int_to_ptr.vmem [resolvable:$true] %s187_s9 }
  0x25   : > { %1645 = sst [smem:[#allocation19_spill]] %s1644_s29  ;;  %s1301_s12 = smov 128  }
  0x26   : > { %p993_p1 = pneg %p1432_p3  ;;  %s1648_s0 = sld [smem:[#allocation20_spill]] }
  0x27   : > { %s1302_s24 = smov 8   ;;  %s205_s1 = scalar_lea.vmem [#allocation2], %s1376_s25 }
  0x28   : > { %s185_s6 = sshll.u32 %s1646_s3, 4  ;;  %p994_p4 = pnand %p993_p1, %p59_p8  ;;  %s186_s6 = int_to_ptr.hbm [resolvable:$true] %s185_s6 }
  0x29   : > { %s215_s3 = sshll.u32 %s205_s1, 4  ;;  %s1649_s21 = sand.u32 1, %s1284_s17   ;;  %s216_s3 = int_to_ptr.vmem [resolvable:$true] %s215_s3 }
  0x2a   : > { %996 = dma.hbm_to_vmem [thread:$0]  (!%p994_p4), %s186_s6, 512, %s188_s9, [#allocation9], %s1301_s12, %s1301_s12, %s1302_s24  }
  0x2b   : > { %s202_s19 = scalar_lea.sflag [#allocation3], %s1649_s21  ;;  %s1650_s8 = smov 32  }
  0x2c   : > { %s212_s5 = scalar_lea.hbm %s1648_s0, %s1379_s26  ;;  %s1651_s28 = smov 512  }
  0x2d   : > { %s213_s11 = sshll.u32 %s212_s5, 4  ;;  %s260_s30 = scalar_lea.hbm %s1621_s2, %s1379_s26  ;;  %s214_s11 = int_to_ptr.hbm [resolvable:$true] %s213_s11 }
  0x2e   : > { %1000 = dma.hbm_to_vmem [thread:$0]  (!%p1381_p6), %s214_s11, 2048, %s216_s3, %s202_s19, %s1651_s28, %s1651_s28, %s1650_s8  }
  0x2f   : > { %s253_s5 = scalar_lea.vmem [#allocation7], %s1376_s25  ;;  %s261_s15 = sshll.u32 %s260_s30, 4  ;;  %s262_s15 = int_to_ptr.hbm [resolvable:$true] %s261_s15 }
  0x30   : > { %s263_s0 = sshll.u32 %s253_s5, 4  ;;  %275 = sbr.rel (%p1432_p3) target bundleno = 654 (0x28e), region = 36  ;;  %s264_s0 = int_to_ptr.vmem [resolvable:$true] %s263_s0 }
  0x31   : > { %1006 = dma.hbm_to_vmem [thread:$0]  (!%p1381_p6), %s262_s15, 2048, %s264_s0, %s1394_s10, %s1651_s28, %s1651_s28, %s1650_s8  }
  0x32   : > { %s1466_s1 = sand.u32 (!%p1432_p3), 1, %s1280_s16  }
  0x33   : > { %s1469_s3 = sshll.u32 (!%p1432_p3), %s1466_s1, 7  ;;  %s278_s19 = scalar_lea.sflag (!%p1432_p3), [#allocation3], %s1466_s1 }
  0x34   : > { %s1473_s21 = scalar_lea.vmem (!%p1432_p3), [#allocation2], %s1469_s3 }
  0x35   : > { %1259 = dma.done.wait (%p1413_p12), %s278_s19, 2048  }
  0x36   : > { %1261 = vsyncadd (%p1413_p12), %s278_s19, 4294965248  ;;  %s287_s0 = sand.u32 1, %s1403_s13   ;;  %s1481_s24 = scalar_lea.vmem [#allocation5], %s1469_s3 }
  0x37   : > { %s288_s15 = scalar_lea.sflag [#allocation6], %s287_s0 }
  0x38   : > { %1263 = dma.done.wait (%p1413_p12), %s288_s15, 4096  }
  0x39   : > { %1265 = vsyncadd (%p1413_p12), %s288_s15, 4294963200  ;;  %s1488_s25 = scalar_lea.vmem [#allocation7], %s1469_s3 }
  0x3a   : > { %1267 = dma.done.wait (%p59_p8), [#allocation9], 512  }
  0x3b   : > { %1269 = vsyncadd (%p59_p8), [#allocation9], 4294966784  ;;  %v375_v0 = vld [vmem:[%s1481_s24 + $0x40] sm:$0xff]  ;;  %v376_v1 = vld [vmem:[%s1481_s24 + $0x48] sm:$0xff]  ;;  %vm583_vm0 = vcmask 261120   ;;  %s1563_s26 = scalar_lea.vmem [#allocation10], %s1469_s3 }
  0x3c   : > { %v379_v2 = vld [vmem:[%s1481_s24 + $0x60] sm:$0xff]  ;;  %v380_v3 = vld [vmem:[%s1481_s24 + $0x68] sm:$0xff]  ;;  %v387_v4 = vpack.c.bf16 %v376_v1, %v375_v0  ;;  %v377_v5 = vld [vmem:[%s1481_s24 + $0x50] sm:$0xff]  ;;  %s980_s27 = sshll.u32 %s1288_s18, 7  ;;  %s795_s12 = sshll.u32 %s1563_s26, 4  ;;  %s796_s12 = int_to_ptr.vmem [resolvable:$true] %s795_s12 }
  0x3d   : > { %v378_v6 = vld [vmem:[%s1481_s24 + $0x58] sm:$0xff]  ;;  %v389_v7 = vpack.c.bf16 %v380_v3, %v379_v2  ;;  %v381_v8 = vld [vmem:[%s1481_s24 + $0x70] sm:$0xff]  ;;  %v367_v11 = vld [vmem:[%s1481_s24] sm:$0xff]  ;;  %s794_s11 = scalar_lea.hbm %s1623_s4, %s980_s27  ;;  %s781_s18 = scalar_lea.sflag [#allocation4], %s1466_s1 }
  0x3e   : > { %v382_v9 = vld [vmem:[%s1481_s24 + $0x78] sm:$0xff]  ;;  %v388_v10 = vpack.c.bf16 %v378_v6, %v377_v5  ;;  %v475_v12 = vunpack.c.l.b16 %v387_v4  ;;  %v476_v13 = vunpack.c.h.b16 %v387_v4  ;;  %v368_v15 = vld [vmem:[%s1481_s24 + $0x8] sm:$0xff]  ;;  %v371_v16 = vld [vmem:[%s1481_s24 + $0x20] sm:$0xff]  ;;  %s797_s13 = sshll.u32 %s794_s11, 4  ;;  %s1226_s9 = scalar_lea.hbm %s1623_s4, 1024  ;;  %s798_s13 = int_to_ptr.hbm [resolvable:$true] %s797_s13 }
  0x3f   : > { %v390_v14 = vpack.c.bf16 %v382_v9, %v381_v8  ;;  %v372_v17 = vld [vmem:[%s1481_s24 + $0x28] sm:$0xff]  ;;  %v479_v18 = vunpack.c.l.b16 %v389_v7  ;;  %v480_v19 = vunpack.c.h.b16 %v389_v7  ;;  %v369_v22 = vld [vmem:[%s1481_s24 + $0x10] sm:$0xff]  ;;  %v370_v23 = vld [vmem:[%s1481_s24 + $0x18] sm:$0xff]  ;;  %v383_v27 = vpack.c.bf16 %v368_v15, %v367_v11  ;;  %s1220_s22 = sshra.s32 %s798_s13, 4  ;;  %s1221_s22 = int_to_ptr.hbm [resolvable:$true] %s1220_s22 }
  0x40   : > { %v477_v20 = vunpack.c.l.b16 %v388_v10  ;;  %v478_v21 = vunpack.c.h.b16 %v388_v10  ;;  %v373_v24 = vld [vmem:[%s1481_s24 + $0x30] sm:$0xff]  ;;  %v385_v28 = vpack.c.bf16 %v372_v17, %v371_v16  ;;  %v374_v29 = vld [vmem:[%s1481_s24 + $0x38] sm:$0xff]  ;;  %v384_v32 = vpack.c.bf16 %v370_v23, %v369_v22  ;;  %v343_v36 = vld [vmem:[%s1473_s21] sm:$0xff]  ;;  %s1222_s29 = scalar_lea.hbm %s1221_s22, 128  ;;  %p1227_p8 = scmp.lt.s32.totalorder %s1221_s22, %s1623_s4 }
  0x41   : > { %v481_v25 = vunpack.c.l.b16 %v390_v14  ;;  %v482_v26 = vunpack.c.h.b16 %v390_v14  ;;  %v487_v30 = vpack.c.b16 %v479_v18, %v475_v12  ;;  %v488_v31 = vpack.c.b16 %v480_v19, %v476_v13  ;;  %v344_v37 = vld [vmem:[%s1473_s21 + $0x8] sm:$0xff]  ;;  %v347_v42 = vld [vmem:[%s1473_s21 + $0x20] sm:$0xff]  ;;  %v345_v44 = vld [vmem:[%s1473_s21 + $0x10] sm:$0xff]  ;;  %p1223_p5 = scmp.ne.s32.totalorder %s1221_s22, %s1222_s29  ;;  %p1228_p9 = scmp.lt.s32.totalorder %s1226_s9, %s1222_s29 }
  0x42   : > { %v386_v33 = vpack.c.bf16 %v374_v29, %v373_v24  ;;  %v467_v38 = vunpack.c.l.b16 %v383_v27  ;;  %v471_v39 = vunpack.c.l.b16 %v385_v28  ;;  %v468_v40 = vunpack.c.h.b16 %v383_v27  ;;  %v348_v43 = vld [vmem:[%s1473_s21 + $0x28] sm:$0xff]  ;;  %v346_v49 = vld [vmem:[%s1473_s21 + $0x18] sm:$0xff]  ;;  %v349_v50 = vld [vmem:[%s1473_s21 + $0x30] sm:$0xff] }
  0x43   : > { %v489_v34 = vpack.c.b16 %v481_v25, %v477_v20  ;;  %v490_v35 = vpack.c.b16 %v482_v26, %v478_v21  ;;  %505 = vmatpush.bf16.xpose.msra.mxu0 %v487_v30  ;;  %524 = vmatpush.bf16.xpose.msra.mxu1 %v488_v31  ;;  %v472_v41 = vunpack.c.h.b16 %v385_v28  ;;  %v469_v45 = vunpack.c.l.b16 %v384_v32  ;;  %v350_v51 = vld [vmem:[%s1473_s21 + $0x38] sm:$0xff]  ;;  %v351_v8 = vld [vmem:[%s1473_s21 + $0x40] sm:$0xff]  ;;  %v352_v9 = vld [vmem:[%s1473_s21 + $0x48] sm:$0xff]  ;;  %p1224_p6 = pnand %p1223_p5, %p1420_p13  ;;  %p1229_p10 = por %p1228_p9, %p1227_p8 }
  0x44   : > { %v473_v46 = vunpack.c.l.b16 %v386_v33  ;;  %v470_v47 = vunpack.c.h.b16 %v384_v32  ;;  %v474_v48 = vunpack.c.h.b16 %v386_v33  ;;  %v359_v52 = vpack.c.bf16 %v344_v37, %v343_v36  ;;  %v355_v10 = vld [vmem:[%s1473_s21 + $0x60] sm:$0xff]  ;;  %v356_v11 = vld [vmem:[%s1473_s21 + $0x68] sm:$0xff]  ;;  %v353_v12 = vld [vmem:[%s1473_s21 + $0x50] sm:$0xff] }
  0x45   : > { %543 = vmatpush.bf16.xpose.msra.mxu2 %v489_v34  ;;  %562 = vmatpush.bf16.xpose.msra.mxu3 %v490_v35  ;;  %v361_v53 = vpack.c.bf16 %v348_v43, %v347_v42  ;;  %v483_v54 = vpack.c.b16 %v471_v39, %v467_v38  ;;  %v484_v55 = vpack.c.b16 %v472_v41, %v468_v40  ;;  %v354_v13 = vld [vmem:[%s1473_s21 + $0x58] sm:$0xff]  ;;  %v357_v14 = vld [vmem:[%s1473_s21 + $0x70] sm:$0xff]  ;;  %v415_v41 = vld [vmem:[#allocation8] sm:$0xff]  ;;  %p1225_p7 = pneg %p1224_p6 }
  0x46   : > { %v360_v56 = vpack.c.bf16 %v346_v49, %v345_v44  ;;  %v362_v57 = vpack.c.bf16 %v350_v51, %v349_v50  ;;  %v485_v58 = vpack.c.b16 %v473_v46, %v469_v45  ;;  %v486_v59 = vpack.c.b16 %v474_v48, %v470_v47  ;;  %v358_v15 = vld [vmem:[%s1473_s21 + $0x78] sm:$0xff] }
  0x47   : > { %v427_v60 = vunpack.c.l.b16 %v359_v52  ;;  %v431_v61 = vunpack.c.l.b16 %v361_v53  ;;  %v428_v62 = vunpack.c.h.b16 %v359_v52  ;;  %v432_v63 = vunpack.c.h.b16 %v361_v53  ;;  %v416_v52 = vld [vmem:[#allocation8 + $0x8] sm:$0xff]  ;;  %p1230_p11 = pnand %p1229_p10, %p1225_p7 }
  0x48   : > { %v429_v0 = vunpack.c.l.b16 %v360_v56  ;;  %v433_v1 = vunpack.c.l.b16 %v362_v57  ;;  %v430_v2 = vunpack.c.h.b16 %v360_v56  ;;  %v434_v3 = vunpack.c.h.b16 %v362_v57 }
  0x49   : > { %v443_v4 = vpack.c.b16 %v431_v61, %v427_v60  ;;  %v444_v5 = vpack.c.b16 %v432_v63, %v428_v62  ;;  %v363_v16 = vpack.c.bf16 %v352_v9, %v351_v8  ;;  %v365_v17 = vpack.c.bf16 %v356_v11, %v355_v10  ;;  %v417_v63 = vld [vmem:[#allocation8 + $0x10] sm:$0xff]  ;;  %v418_v8 = vld [vmem:[#allocation8 + $0x18] sm:$0xff] }
  0x4a   : > { %v445_v6 = vpack.c.b16 %v433_v1, %v429_v0  ;;  %v446_v7 = vpack.c.b16 %v434_v3, %v430_v2  ;;  %v364_v18 = vpack.c.bf16 %v354_v13, %v353_v12  ;;  %v366_v19 = vpack.c.bf16 %v358_v15, %v357_v14  ;;  %v401_v15 = vld [vmem:[%s1488_s25 + $0x50] sm:$0xff] }
  0x4b   : > { %506 = vmatpush.bf16.xpose.msra.mxu0 %v483_v54  ;;  %525 = vmatpush.bf16.xpose.msra.mxu1 %v484_v55  ;;  %v435_v20 = vunpack.c.l.b16 %v363_v16  ;;  %v439_v21 = vunpack.c.l.b16 %v365_v17  ;;  %v436_v22 = vunpack.c.h.b16 %v363_v16  ;;  %v440_v23 = vunpack.c.h.b16 %v365_v17  ;;  %v402_v16 = vld [vmem:[%s1488_s25 + $0x58] sm:$0xff]  ;;  %v405_v17 = vld [vmem:[%s1488_s25 + $0x70] sm:$0xff] }
  0x4c   : > { %v437_v24 = vunpack.c.l.b16 %v364_v18  ;;  %v441_v25 = vunpack.c.l.b16 %v366_v19  ;;  %v438_v26 = vunpack.c.h.b16 %v364_v18  ;;  %v442_v27 = vunpack.c.h.b16 %v366_v19  ;;  %v406_v18 = vld [vmem:[%s1488_s25 + $0x78] sm:$0xff] }
  0x4d   : > { %544 = vmatpush.bf16.xpose.msra.mxu2 %v485_v58  ;;  %563 = vmatpush.bf16.xpose.msra.mxu3 %v486_v59  ;;  %v447_v28 = vpack.c.b16 %v439_v21, %v435_v20  ;;  %v448_v29 = vpack.c.b16 %v440_v23, %v436_v22  ;;  %v412_v19 = vpack.c.bf16 %v402_v16, %v401_v15  ;;  %v399_v20 = vld [vmem:[%s1488_s25 + $0x40] sm:$0xff]  ;;  %v400_v21 = vld [vmem:[%s1488_s25 + $0x48] sm:$0xff] }
  0x4e   : > { %v449_v30 = vpack.c.b16 %v441_v25, %v437_v24  ;;  %v450_v31 = vpack.c.b16 %v442_v27, %v438_v26  ;;  %v414_v22 = vpack.c.bf16 %v406_v18, %v405_v17  ;;  %v403_v23 = vld [vmem:[%s1488_s25 + $0x60] sm:$0xff]  ;;  %v404_v24 = vld [vmem:[%s1488_s25 + $0x68] sm:$0xff]  ;;  %v411_v25 = vpack.c.bf16 %v400_v21, %v399_v20 }
  0x4f   : > { %v660_v27 = vunpack.c.l.b16 %v412_v19 }
  0x52   : > { %507 = vmatmul.bf16.vlgmr.msra.gmra.mxu0 %v443_v4  ;;  %526 = vmatmul.bf16.vlgmr.msra.gmra.mxu1 %v444_v5 }
  0x54   : > { %545 = vmatmul.bf16.vlgmr.msra.gmra.mxu2 %v445_v6  ;;  %564 = vmatmul.bf16.vlgmr.msra.gmra.mxu3 %v446_v7 }
  0x62   : > { %512 = vmatmul.bf16.gmra.mxu0 %v447_v28  ;;  %531 = vmatmul.bf16.gmra.mxu1 %v448_v29  ;;  %v661_v28 = vunpack.c.h.b16 %v412_v19  ;;  %v413_v29 = vpack.c.bf16 %v404_v24, %v403_v23 }
  0x64   : > { %550 = vmatmul.bf16.gmra.mxu2 %v449_v30  ;;  %569 = vmatmul.bf16.gmra.mxu3 %v450_v31  ;;  %v664_v31 = vunpack.c.l.b16 %v414_v22 }
  0xcf   : > { %v508_v32 = vpop.f32.mrf.mxu0  ;;  %v527_v33 = vpop.f32.mrf.mxu1 }
  0xd0   : > { %v528_v34 = vadd.f32 %v527_v33, %v508_v32  ;;  %v665_v32 = vunpack.c.h.b16 %v414_v22  ;;  %v658_v33 = vunpack.c.l.b16 %v411_v25 }
  0xd7   : > { %v546_v35 = vpop.f32.mrf.mxu2  ;;  %v565_v36 = vpop.f32.mrf.mxu3 }
  0xd8   : > { %v547_v37 = vadd.f32 %v546_v35, %v528_v34  ;;  %v510_v38 = vpop.f32.mrf.mxu0  ;;  %v529_v39 = vpop.f32.mrf.mxu1  ;;  %v662_v34 = vunpack.c.l.b16 %v413_v29  ;;  %v659_v35 = vunpack.c.h.b16 %v411_v25 }
  0xd9   : > { %v530_v43 = vadd.f32 %v529_v39, %v510_v38  ;;  %v672_v39 = vpack.c.b16 %v664_v31, %v660_v27 }
  0xda   : > { %v566_v40 = vadd.f32 %v565_v36, %v547_v37  ;;  %v663_v36 = vunpack.c.h.b16 %v413_v29 }
  0xdb   : > { %732 = vmatpush.bf16.msrb.mxu2 %v672_v39 }
  0xdc   : > { %v575_v42 = vmul.f32 0.044194173, %v566_v40  ;;  %v673_v40 = vpack.c.b16 %v665_v32, %v661_v28 }
  0xde   : > { %v579_v44 = vadd.f32 %v575_v42, %v415_v41  ;;  %v670_v42 = vpack.c.b16 %v662_v34, %v658_v33  ;;  %751 = vmatpush.bf16.msrb.mxu3 %v673_v40 }
  0xdf   : > { %v548_v45 = vpop.f32.mrf.mxu2  ;;  %v567_v46 = vpop.f32.mrf.mxu3 }
  0xe0   : > { %v549_v47 = vadd.f32 %v548_v45, %v530_v43  ;;  %v584_v48 = vsel %vm583_vm0, %v579_v44, -inf  ;;  %v532_v49 = vpop.f32.mrf.mxu1  ;;  %v513_v50 = vpop.f32.mrf.mxu0  ;;  %v671_v43 = vpack.c.b16 %v663_v36, %v659_v35  ;;  %694 = vmatpush.bf16.msrb.mxu0 %v670_v42 }
  0xe1   : > { %585 = vmax.xlane.f32.xlu0 %v584_v48  ;;  %v533_v54 = vadd.f32 %v532_v49, %v513_v50 }
  0xe2   : > { %v568_v51 = vadd.f32 %v567_v46, %v549_v47  ;;  %713 = vmatpush.bf16.msrb.mxu1 %v671_v43 }
  0xe4   : > { %v576_v53 = vmul.f32 0.044194173, %v568_v51 }
  0xe6   : > { %v580_v55 = vadd.f32 %v576_v53, %v416_v52 }
  0xe7   : > { %v551_v56 = vpop.f32.mrf.mxu2  ;;  %v570_v57 = vpop.f32.mrf.mxu3 }
  0xe8   : > { %v552_v58 = vadd.f32 %v551_v56, %v533_v54  ;;  %v587_v59 = vsel %vm583_vm0, %v580_v55, -inf  ;;  %v534_v61 = vpop.f32.mrf.mxu1  ;;  %v515_v62 = vpop.f32.mrf.mxu0  ;;  %v393_v56 = vld [vmem:[%s1488_s25 + $0x10] sm:$0xff] }
  0xe9   : > { %588 = vmax.xlane.f32.xlu0 %v587_v59  ;;  %v535_v1 = vadd.f32 %v534_v61, %v515_v62  ;;  %v398_v59 = vld [vmem:[%s1488_s25 + $0x38] sm:$0xff]  ;;  %v391_v62 = vld [vmem:[%s1488_s25] sm:$0xff] }
  0xea   : > { %v571_v60 = vadd.f32 %v570_v57, %v552_v58  ;;  %v394_v57 = vld [vmem:[%s1488_s25 + $0x18] sm:$0xff]  ;;  %v397_v58 = vld [vmem:[%s1488_s25 + $0x30] sm:$0xff] }
  0xeb   : > { %v410_v61 = vpack.c.bf16 %v398_v59, %v397_v58 }
  0xec   : > { %v577_v0 = vmul.f32 0.044194173, %v571_v60  ;;  %v408_v60 = vpack.c.bf16 %v394_v57, %v393_v56 }
  0xee   : > { %v581_v2 = vadd.f32 %v577_v0, %v417_v63  ;;  %v392_v63 = vld [vmem:[%s1488_s25 + $0x8] sm:$0xff]  ;;  %v395_v0 = vld [vmem:[%s1488_s25 + $0x20] sm:$0xff] }
  0xef   : > { %v553_v3 = vpop.f32.mrf.mxu2  ;;  %v572_v6 = vpop.f32.mrf.mxu3 }
  0xf0   : > { %v554_v4 = vadd.f32 %v553_v3, %v535_v1  ;;  %v590_v5 = vsel %vm583_vm0, %v581_v2, -inf  ;;  %v652_v1 = vunpack.c.l.b16 %v408_v60  ;;  %v396_v3 = vld [vmem:[%s1488_s25 + $0x28] sm:$0xff] }
  0xf1   : > { %591 = vmax.xlane.f32.xlu1 %v590_v5  ;;  %v656_v5 = vunpack.c.l.b16 %v410_v61 }
  0xf2   : > { %v573_v7 = vadd.f32 %v572_v6, %v554_v4  ;;  %v407_v4 = vpack.c.bf16 %v392_v63, %v391_v62  ;;  %v657_v6 = vunpack.c.h.b16 %v410_v61 }
  0xf4   : > { %v578_v9 = vmul.f32 0.044194173, %v573_v7  ;;  %v409_v7 = vpack.c.bf16 %v396_v3, %v395_v0 }
  0xf6   : > { %v582_v10 = vadd.f32 %v578_v9, %v418_v8  ;;  %v650_v8 = vunpack.c.l.b16 %v407_v4  ;;  %v651_v9 = vunpack.c.h.b16 %v407_v4 }
  0xf8   : > { %v593_v11 = vsel %vm583_vm0, %v582_v10, -inf }
  0xf9   : > { %594 = vmax.xlane.f32.xlu1 %v593_v11 }
 0x154   : > { %v586_v12 = vpop.xlane.xlu0 %585 }
 0x155   : > { %v596_v13 = vsub.f32 %v579_v44, %v586_v12  ;;  %v654_v12 = vunpack.c.l.b16 %v409_v7 }
 0x157   : > { %v600_v14 = vmul.f32 1.442695, %v596_v13  ;;  %v655_v13 = vunpack.c.h.b16 %v409_v7 }
 0x159   : > { %1070 = vpow2.f32 %v600_v14  ;;  %v666_v14 = vpack.c.b16 %v654_v12, %v650_v8  ;;  %v667_v15 = vpack.c.b16 %v655_v13, %v651_v9 }
 0x15b   : > { %695 = vmatpush.bf16.msrb.mxu0 %v666_v14  ;;  %714 = vmatpush.bf16.msrb.mxu1 %v667_v15 }
 0x15c   : > { %v589_v26 = vpop.xlane.xlu0 %588 }
 0x15d   : > { %v597_v30 = vsub.f32 %v580_v55, %v589_v26 }
 0x15f   : > { %v1538_v37 = vpop.eup %1070  ;;  %v602_v38 = vmul.f32 1.442695, %v597_v30 }
 0x160   : > { %v608_v41 = vsel %vm583_vm0, %v1538_v37, 0.0 }
 0x161   : > { %1072 = vpow2.f32 %v602_v38  ;;  %609 = vadd.xlane.f32.xlu2 %v608_v41 }
 0x164   : > { %v592_v44 = vpop.xlane.xlu1 %591 }
 0x165   : > { %v598_v45 = vsub.f32 %v581_v2, %v592_v44  ;;  %v653_v2 = vunpack.c.h.b16 %v408_v60 }
 0x167   : > { %v1073_v46 = vpop.eup %1072  ;;  %v604_v47 = vmul.f32 1.442695, %v598_v45  ;;  %v669_v11 = vpack.c.b16 %v657_v6, %v653_v2 }
 0x168   : > { %v611_v48 = vsel %vm583_vm0, %v1073_v46, 0.0 }
 0x169   : > { %1074 = vpow2.f32 %v604_v47  ;;  %612 = vadd.xlane.f32.xlu2 %v611_v48  ;;  %752 = vmatpush.bf16.msrb.mxu3 %v669_v11 }
 0x16c   : > { %v595_v49 = vpop.xlane.xlu1 %594 }
 0x16d   : > { %v599_v50 = vsub.f32 %v582_v10, %v595_v49  ;;  %v668_v10 = vpack.c.b16 %v656_v5, %v652_v1 }
 0x16f   : > { %v1075_v51 = vpop.eup %1074  ;;  %v606_v52 = vmul.f32 1.442695, %v599_v50  ;;  %733 = vmatpush.bf16.msrb.mxu2 %v668_v10 }
 0x170   : > { %v614_v53 = vsel %vm583_vm0, %v1075_v51, 0.0 }
 0x171   : > { %1076 = vpow2.f32 %v606_v52  ;;  %615 = vadd.xlane.f32.xlu0 %v614_v53 }
 0x177   : > { %v1077_v54 = vpop.eup %1076 }
 0x178   : > { %v617_v55 = vsel %vm583_vm0, %v1077_v54, 0.0 }
 0x179   : > { %618 = vadd.xlane.f32.xlu1 %v617_v55 }
 0x1d4   : > { %v610_v16 = vpop.xlane.xlu2 %609 }
 0x1d5   : > { %1078 = vrcp.f32 %v610_v16 }
 0x1db   : > { %v1079_v18 = vpop.eup %1078 }
 0x1dc   : > { %v613_v17 = vpop.xlane.xlu2 %612  ;;  %v624_v19 = vmul.f32 %v1079_v18, %v1538_v37 }
 0x1dd   : > { %1080 = vrcp.f32 %v613_v17 }
 0x1de   : > { %v628_v21 = vpack.c.bf16 %v624_v19, %v624_v19 }
 0x1e0   : > { %v636_v25 = vunpack.c.l.b16 %v628_v21 }
 0x1e3   : > { %v1081_v20 = vpop.eup %1080 }
 0x1e4   : > { %v625_v22 = vmul.f32 %v1081_v20, %v1073_v46  ;;  %v616_v23 = vpop.xlane.xlu0 %615 }
 0x1e5   : > { %1082 = vrcp.f32 %v616_v23 }
 0x1e6   : > { %v629_v24 = vpack.c.bf16 %v625_v22, %v625_v22 }
 0x1e8   : > { %v637_v26 = vunpack.c.l.b16 %v629_v24 }
 0x1ea   : > { %v640_v27 = vpack.c.b16 %v637_v26, %v636_v25 }
 0x1eb   : > { %v1083_v29 = vpop.eup %1082 }
 0x1ec   : > { %964 = vmatmul.msk.bf16.vlgmr.msrb.gmra.mxu0 %vm583_vm0, %v640_v27  ;;  %966 = vmatmul.msk.bf16.vlgmr.msrb.gmra.mxu1 %vm583_vm0, %v640_v27  ;;  %v619_v28 = vpop.xlane.xlu1 %618  ;;  %v626_v30 = vmul.f32 %v1083_v29, %v1075_v51 }
 0x1ed   : > { %968 = vmatmul.msk.bf16.vlgmr.msrb.gmra.mxu2 %vm583_vm0, %v640_v27  ;;  %970 = vmatmul.msk.bf16.vlgmr.msrb.gmra.mxu3 %vm583_vm0, %v640_v27  ;;  %1084 = vrcp.f32 %v619_v28 }
 0x1ee   : > { %v630_v32 = vpack.c.bf16 %v626_v30, %v626_v30 }
 0x1f0   : > { %v638_v35 = vunpack.c.l.b16 %v630_v32 }
 0x1f3   : > { %v1085_v31 = vpop.eup %1084 }
 0x1f4   : > { %v627_v33 = vmul.f32 %v1085_v31, %v1077_v54 }
 0x1f6   : > { %v631_v34 = vpack.c.bf16 %v627_v33, %v627_v33 }
 0x1f8   : > { %v639_v36 = vunpack.c.l.b16 %v631_v34 }
 0x1fa   : > { %v641_v37 = vpack.c.b16 %v639_v36, %v638_v35 }
 0x1fc   : > { %965 = vmatmul.msk.bf16.gmra.mxu0 %vm583_vm0, %v641_v37  ;;  %967 = vmatmul.msk.bf16.gmra.mxu1 %vm583_vm0, %v641_v37 }
 0x1fd   : > { %969 = vmatmul.msk.bf16.gmra.mxu2 %vm583_vm0, %v641_v37  ;;  %971 = vmatmul.msk.bf16.gmra.mxu3 %vm583_vm0, %v641_v37 }
 0x269   : > { %v697_v38 = vpop.f32.mrf.mxu0  ;;  %v716_v39 = vpop.f32.mrf.mxu1 }
 0x26a   : > { %764 = vst [vmem:[%s1563_s26] sm:$0xff] %v697_v38 }
 0x26b   : > { %765 = vst [vmem:[%s1563_s26 + $0x8] sm:$0xff] %v716_v39 }
 0x270   : > { %v735_v40 = vpop.f32.mrf.mxu2  ;;  %v754_v41 = vpop.f32.mrf.mxu3 }
 0x271   : > { %766 = vst [vmem:[%s1563_s26 + $0x10] sm:$0xff] %v735_v40  ;;  %v699_v42 = vpop.f32.mrf.mxu0  ;;  %v718_v43 = vpop.f32.mrf.mxu1 }
 0x272   : > { %767 = vst [vmem:[%s1563_s26 + $0x18] sm:$0xff] %v754_v41 }
 0x273   : > { %768 = vst [vmem:[%s1563_s26 + $0x20] sm:$0xff] %v699_v42 }
 0x274   : > { %769 = vst [vmem:[%s1563_s26 + $0x28] sm:$0xff] %v718_v43 }
 0x278   : > { %v737_v44 = vpop.f32.mrf.mxu2  ;;  %v756_v45 = vpop.f32.mrf.mxu3 }
 0x279   : > { %770 = vst [vmem:[%s1563_s26 + $0x30] sm:$0xff] %v737_v44  ;;  %v702_v46 = vpop.f32.mrf.mxu0  ;;  %v721_v47 = vpop.f32.mrf.mxu1 }
 0x27a   : > { %771 = vst [vmem:[%s1563_s26 + $0x38] sm:$0xff] %v756_v45 }
 0x27b   : > { %772 = vst [vmem:[%s1563_s26 + $0x40] sm:$0xff] %v702_v46 }
 0x27c   : > { %773 = vst [vmem:[%s1563_s26 + $0x48] sm:$0xff] %v721_v47 }
 0x280   : > { %v740_v48 = vpop.f32.mrf.mxu2  ;;  %v759_v49 = vpop.f32.mrf.mxu3 }
 0x281   : > { %774 = vst [vmem:[%s1563_s26 + $0x50] sm:$0xff] %v740_v48  ;;  %v704_v50 = vpop.f32.mrf.mxu0  ;;  %v723_v51 = vpop.f32.mrf.mxu1 }
 0x282   : > { %775 = vst [vmem:[%s1563_s26 + $0x58] sm:$0xff] %v759_v49 }
 0x283   : > { %776 = vst [vmem:[%s1563_s26 + $0x60] sm:$0xff] %v704_v50 }
 0x284   : > { %777 = vst [vmem:[%s1563_s26 + $0x68] sm:$0xff] %v723_v51 }
 0x288   : > { %v742_v52 = vpop.f32.mrf.mxu2  ;;  %v761_v53 = vpop.f32.mrf.mxu3 }
 0x289   : > { %778 = vst [vmem:[%s1563_s26 + $0x70] sm:$0xff] %v742_v52 }
 0x28a   : > { %779 = vst [vmem:[%s1563_s26 + $0x78] sm:$0xff] %v761_v53 }
 0x28b   : > { %1233 = shalt.err (!%p1230_p11)
}
 0x28c   : > { %s1303_s30 = smov 512   ;;  %s1304_s5 = smov 32  }
 0x28d   : > { %991 = dma.vmem_to_hbm [thread:$0]  (%p1420_p13), %s796_s12, 2048, %s798_s13, %s781_s18, %s1303_s30, %s1303_s30, %s1304_s5  }
 0x28e PF: > { %s1652_s1 = sld [smem:[#allocation15_spill]]  ;;  %p1014_p12 = scmp.ge.s32.totalorder %s1296_s20, 2 }
 0x290   : > { %p1008_p2 = pnand %p1014_p12, %p1424_p0 }
 0x292   : > { %p1009_p3 = pneg %p1008_p2 }
 0x294   : > { %s812_s19 = sand.u32 1, %s1652_s1  }
 0x295   : > { %s813_s21 = scalar_lea.sflag [#allocation4], %s812_s19 }
 0x296   : > { %1271 = dma.done.wait (%p1009_p3), %s813_s21, 2048  }
 0x297   : > { %1273 = vsyncadd (%p1009_p3), %s813_s21, 4294965248  ;;  %s24_s20 = sadd.s32 1, %s1296_s20   ;;  %s1654_s0 = sld [smem:[#allocation18_spill]] }
 0x298   : > { %p21_p1 = scmp.ge.s32.totalorder %s24_s20, 10   ;;  %s1655_s18 = sld [smem:[#allocation16_spill]] }
 0x299   : > { %s1656_s19 = sld [smem:[#allocation17_spill]]  ;;  %s1657_s15 = smov %s1280_s16 }
 0x29a   : > { %s1658_s16 = smov %s1284_s17  ;;  %23 = sbr.rel (!%p21_p1) target bundleno = 13 (0xd), region = 109 }
 0x29d   : > { %s1659_s17 = smov %s1654_s0 }
 0x29f   :  { %819 = vsyncpa [#allocation3], 1 }
 0x2a0   :  { %821 = vsyncpa [#allocation3 + $0x1], 1 }
 0x2a1   :  { %822 = vsyncpa [#allocation6], 1 }
 0x2a2   :  { %824 = vsyncpa [#allocation6 + $0x1], 1 }
 0x2a3   :  { %825 = vsyncpa [#allocation9], 1 }
 0x2a4   :  { %826 = vsyncpa [#allocation4], 1 }
 0x2a5   :  { %828 = vsyncpa [#allocation4 + $0x1], 1 }

</bundles_post_ra>
